<compile_context>
chip_gen: v7x
topology: tpu7x:2x2x1
jax: 0.10.0
libtpu: 0.0.40
codegen_flags: <defaults>
</compile_context>

<pallas_src>
import math

import jax
import jax.numpy as jnp
from jax.experimental import pallas as pl
from jax.experimental.pallas import tpu as pltpu


_LN_EPS = 1e-5  # PyTorch nn.LayerNorm default


def _vmem_limit_bytes():
    try:
        info = pltpu.get_tpu_info()
        cap = getattr(info, "vmem_capacity_bytes", 64 * 1024 * 1024)
    except Exception:
        cap = 64 * 1024 * 1024
    # ~3/4 of physical VMEM, capped: 96 MiB on v5e/v6e, 48 MiB on v7x.
    return int(min(cap * 3 // 4, 100 * 1024 * 1024))


_VMEM_LIMIT = _vmem_limit_bytes()


def _fit(dim, pref):
    """Use the preferred tile if it divides the dim, else fall back to full dim."""
    return pref if dim % pref == 0 else dim


# ---------------------- Fused LayerNorm1 + QKV projection ---------------------

def _ln_qkv_kernel(x_ref, g_ref, b_ref, w_ref, bias_ref, o_ref):
    x = x_ref[...]                                        # (tm, C) f32
    mu = jnp.mean(x, axis=-1, keepdims=True)
    xc = x - mu
    var = jnp.mean(xc * xc, axis=-1, keepdims=True)
    ln = (xc * jax.lax.rsqrt(var + _LN_EPS) * g_ref[...] + b_ref[...]
          ).astype(jnp.bfloat16)
    qkv = jnp.dot(ln, w_ref[...], preferred_element_type=jnp.float32)
    o_ref[...] = (qkv + bias_ref[...]).astype(o_ref.dtype)


def ln_qkv(x2d, gamma, beta, w_qkv, b_qkv, *, out_dtype=jnp.bfloat16, tm=256):
    """x2d: (M, C) f32, w_qkv: (C, 3C) bf16, b_qkv: (3C,) f32 -> (M, 3C) bf16."""
    M, C = x2d.shape
    N3 = w_qkv.shape[1]
    tm = _fit(M, tm)
    flops = 2 * M * C * N3
    bytes_acc = int(M * C * 4 + C * N3 * 2 + (N3 + 2 * C) * 4
                    + M * N3 * jnp.dtype(out_dtype).itemsize)
    return pl.pallas_call(
        _ln_qkv_kernel,
        grid=(M // tm,),
        in_specs=[
            pl.BlockSpec((tm, C), lambda i: (i, 0)),
            pl.BlockSpec((1, C), lambda i: (0, 0)),
            pl.BlockSpec((1, C), lambda i: (0, 0)),
            pl.BlockSpec((C, N3), lambda i: (0, 0)),
            pl.BlockSpec((1, N3), lambda i: (0, 0)),
        ],
        out_specs=pl.BlockSpec((tm, N3), lambda i: (i, 0)),
        out_shape=jax.ShapeDtypeStruct((M, N3), out_dtype),
        compiler_params=pltpu.CompilerParams(
            dimension_semantics=("parallel",),
            vmem_limit_bytes=_VMEM_LIMIT,
        ),
        cost_estimate=pl.CostEstimate(
            flops=flops, transcendentals=M, bytes_accessed=bytes_acc),
    )(x2d, gamma.reshape(1, C), beta.reshape(1, C), w_qkv, b_qkv.reshape(1, N3))


# ------------------- Fused attention + projection + residual ------------------

def _make_attn_kernel(num_heads, head_dim):
    C = num_heads * head_dim
    scale = 1.0 / math.sqrt(head_dim)

    def kernel(x_ref, qkv_ref, wp_ref, bp_ref, o_ref, ctx_ref):
        # TODO(synk): flash-style KV tiling (online softmax) for long sequences;
        # the full (N, N) per-head score matrix is materialized here (fine at
        # ViT scale N<=~600, a VMEM wall beyond that -- hits v7x first).
        # TODO(synk): head-granularity lane slices below (offset h*D with
        # D % 128 != 0) force Mosaic relayouts; a (B, 3, H, N, D) qkv layout
        # delivered via BlockSpec would make the split DMA-side.
        qkv = qkv_ref[0]                                  # (N, 3C) bf16

        for h in range(num_heads):
            q = qkv[:, h * head_dim:(h + 1) * head_dim]
            k = qkv[:, C + h * head_dim:C + (h + 1) * head_dim]
            v = qkv[:, 2 * C + h * head_dim:2 * C + (h + 1) * head_dim]

            # q @ k^T without materializing k.T (contract last dims directly).
            s = jax.lax.dot_general(q, k, (((1,), (1,)), ((), ())),
                                    preferred_element_type=jnp.float32) * scale
            s = s - jnp.max(s, axis=-1, keepdims=True)
            p = jnp.exp(s)
            p = p * pl.reciprocal(jnp.sum(p, axis=-1, keepdims=True), approx=True)

            o_h = jnp.dot(p.astype(jnp.bfloat16), v,
                          preferred_element_type=jnp.float32)        # (N, D)
            # Stash per-head context; projection happens once after the loop
            # with full-C contraction (no per-head K=head_dim matmuls, no
            # serial accumulate chain).
            ctx_ref[:, h * head_dim:(h + 1) * head_dim] = o_h.astype(ctx_ref.dtype)

        proj = jnp.dot(ctx_ref[...], wp_ref[...],
                       preferred_element_type=jnp.float32)           # (N, C)
        o_ref[0] = x_ref[0] + proj + bp_ref[...]

    return kernel


def attention(x, qkv, w_proj, b_proj, num_heads):
    """x: (B,N,C) f32 residual, qkv: (B,N,3C) bf16, w_proj bf16 -> (B,N,C) f32."""
    B, N, C = x.shape
    D = C // num_heads
    flops = B * (num_heads * (4 * N * N * D) + 2 * N * C * C)
    bytes_acc = int(2 * x.size * 4 + qkv.size * 2 + w_proj.size * 2 + C * 4)
    # NOTE(v7x): grid=(B,) "parallel" load-balances across the 2 TensorCores
    # when B >= 2; for B == 1 add a query-row tile axis for balance.
    return pl.pallas_call(
        _make_attn_kernel(num_heads, D),
        grid=(B,),
        in_specs=[
            pl.BlockSpec((1, N, C), lambda b: (b, 0, 0)),
            pl.BlockSpec((1, N, 3 * C), lambda b: (b, 0, 0)),
            pl.BlockSpec((C, C), lambda b: (0, 0)),
            pl.BlockSpec((1, C), lambda b: (0, 0)),
        ],
        out_specs=pl.BlockSpec((1, N, C), lambda b: (b, 0, 0)),
        out_shape=jax.ShapeDtypeStruct((B, N, C), jnp.float32),
        scratch_shapes=[pltpu.VMEM((N, C), jnp.bfloat16)],
        compiler_params=pltpu.CompilerParams(
            dimension_semantics=("parallel",),
            vmem_limit_bytes=_VMEM_LIMIT,
        ),
        cost_estimate=pl.CostEstimate(
            flops=flops, transcendentals=B * num_heads * N * N,
            bytes_accessed=bytes_acc),
    )(x, qkv, w_proj, b_proj.reshape(1, C))


# ------- Fused LayerNorm2 + MLP + residual kernel (hidden-dim tiled) ----------

def _mlp_kernel(y_ref, g_ref, b_ref, w1_ref, b1_ref, w2_ref, b2_ref, o_ref,
                acc_ref, ln_ref):
    j = pl.program_id(1)

    @pl.when(j == 0)
    def _():
        y = y_ref[...]                                    # (tm, C) f32
        mu = jnp.mean(y, axis=-1, keepdims=True)
        yc = y - mu
        var = jnp.mean(yc * yc, axis=-1, keepdims=True)
        ln_ref[...] = (yc * jax.lax.rsqrt(var + _LN_EPS) * g_ref[...]
                       + b_ref[...]).astype(ln_ref.dtype)
        acc_ref[...] = jnp.zeros_like(acc_ref)

    h = jnp.dot(ln_ref[...], w1_ref[...],
                preferred_element_type=jnp.float32) + b1_ref[...]     # (tm, th)
    # TODO(synk): PyTorch nn.GELU() is the exact erf form; tanh approximation
    # is used here (EUP-friendly, <1e-3 deviation).
    h = jax.nn.gelu(h, approximate=True)
    acc_ref[...] += jnp.dot(h.astype(jnp.bfloat16), w2_ref[...],
                            preferred_element_type=jnp.float32)       # (tm, C)

    @pl.when(j == pl.num_programs(1) - 1)
    def _():
        o_ref[...] = y_ref[...] + acc_ref[...] + b2_ref[...]          # residual


def mlp_block(y2d, ln_g, ln_b, w1, b1, w2, b2, *, tm=256, th=512):
    M, C = y2d.shape
    H4 = w1.shape[1]
    tm = _fit(M, tm)
    th = _fit(H4, th)
    flops = 4 * M * C * H4
    bytes_acc = int(2 * M * C * 4 + (C * H4 + H4 * C) * 2 + (H4 + 3 * C) * 4)
    return pl.pallas_call(
        _mlp_kernel,
        grid=(M // tm, H4 // th),
        in_specs=[
            pl.BlockSpec((tm, C), lambda i, j: (i, 0)),
            pl.BlockSpec((1, C), lambda i, j: (0, 0)),
            pl.BlockSpec((1, C), lambda i, j: (0, 0)),
            pl.BlockSpec((C, th), lambda i, j: (0, j)),
            pl.BlockSpec((1, th), lambda i, j: (0, j)),
            pl.BlockSpec((th, C), lambda i, j: (j, 0)),
            pl.BlockSpec((1, C), lambda i, j: (0, 0)),
        ],
        out_specs=pl.BlockSpec((tm, C), lambda i, j: (i, 0)),
        out_shape=jax.ShapeDtypeStruct((M, C), jnp.float32),
        scratch_shapes=[pltpu.VMEM((tm, C), jnp.float32),
                        pltpu.VMEM((tm, C), jnp.bfloat16)],
        compiler_params=pltpu.CompilerParams(
            dimension_semantics=("parallel", "arbitrary"),
            vmem_limit_bytes=_VMEM_LIMIT,
        ),
        cost_estimate=pl.CostEstimate(
            flops=flops, transcendentals=M * H4 + M, bytes_accessed=bytes_acc),
    )(y2d, ln_g.reshape(1, C), ln_b.reshape(1, C),
      w1, b1.reshape(1, H4), w2, b2.reshape(1, C))


# --------------------------------- Forward ------------------------------------

def transformer_encoder(x, params, *, num_heads):
    B, N, C = x.shape
    M = B * N
    bf16 = jnp.bfloat16

    # Fused LayerNorm1 + QKV projection (bf16 out, ready for the MXU).
    qkv = ln_qkv(x.reshape(M, C), params["ln1_g"], params["ln1_b"],
                 params["w_qkv"].astype(bf16), params["b_qkv"])
    qkv = qkv.reshape(B, N, 3 * C)   # contiguous, metadata-only reshape

    # Fused attention + single full-K output projection + residual.
    y1 = attention(x, qkv, params["w_proj"].astype(bf16), params["b_proj"],
                   num_heads)

    # Fused LayerNorm2 + MLP (hidden-dim tiled) + residual.
    y2 = mlp_block(y1.reshape(M, C), params["ln2_g"], params["ln2_b"],
                   params["w_fc1"].astype(bf16), params["b_fc1"],
                   params["w_fc2"].astype(bf16), params["b_fc2"])
    return y2.reshape(B, N, C)


# ------------------------------ Params / reference ----------------------------

def init_params(key, embed_dim, mlp_ratio=4.0):
    hidden = int(embed_dim * mlp_ratio)
    keys = jax.random.split(key, 8)

    def lin(kw, kb, fan_in, fan_out):
        bound = 1.0 / math.sqrt(fan_in)
        w = jax.random.uniform(kw, (fan_in, fan_out), jnp.float32, -bound, bound)
        b = jax.random.uniform(kb, (fan_out,), jnp.float32, -bound, bound)
        return w, b

    w_qkv, b_qkv = lin(keys[0], keys[1], embed_dim, 3 * embed_dim)
    w_proj, b_proj = lin(keys[2], keys[3], embed_dim, embed_dim)
    w_fc1, b_fc1 = lin(keys[4], keys[5], embed_dim, hidden)
    w_fc2, b_fc2 = lin(keys[6], keys[7], hidden, embed_dim)
    ones = jnp.ones((embed_dim,), jnp.float32)
    zeros = jnp.zeros((embed_dim,), jnp.float32)
    return {
        "ln1_g": ones, "ln1_b": zeros, "ln2_g": ones, "ln2_b": zeros,
        "w_qkv": w_qkv, "b_qkv": b_qkv, "w_proj": w_proj, "b_proj": b_proj,
        "w_fc1": w_fc1, "b_fc1": b_fc1, "w_fc2": w_fc2, "b_fc2": b_fc2,
    }


def _reference(x, params, num_heads):
    # Pure-JAX f32 reference mirroring the PyTorch TransformerEncoder forward.
    B, N, C = x.shape
    D = C // num_heads

    def ln(z, g, b):
        mu = z.mean(-1, keepdims=True)
        var = ((z - mu) ** 2).mean(-1, keepdims=True)
        return (z - mu) / jnp.sqrt(var + _LN_EPS) * g + b

    h = ln(x, params["ln1_g"], params["ln1_b"])
    qkv = h.reshape(B * N, C) @ params["w_qkv"] + params["b_qkv"]
    qkv = qkv.reshape(B, N, 3, num_heads, D).transpose(2, 0, 3, 1, 4)
    q, k, v = qkv[0], qkv[1], qkv[2]
    attn = jnp.einsum("bhqd,bhkd->bhqk", q, k) * (1.0 / math.sqrt(D))
    attn = jax.nn.softmax(attn, axis=-1)
    o = jnp.einsum("bhqk,bhkd->bhqd", attn, v)
    o = o.transpose(0, 2, 1, 3).reshape(B * N, C)
    o = o @ params["w_proj"] + params["b_proj"]
    y = x + o.reshape(B, N, C)

    h2 = ln(y, params["ln2_g"], params["ln2_b"])
    m = h2.reshape(B * N, C) @ params["w_fc1"] + params["b_fc1"]
    m = jax.nn.gelu(m, approximate=False)      # PyTorch nn.GELU (exact erf)
    m = m @ params["w_fc2"] + params["b_fc2"]
    return y + m.reshape(B, N, C)


if __name__ == "__main__":
    B, N, C, H = 2, 8, 32, 4   # batch, seq, embed_dim, num_heads

    key = jax.random.PRNGKey(0)
    kx, kp = jax.random.split(key)
    x = jax.random.normal(kx, (B, N, C), dtype=jnp.float32)
    params = init_params(kp, C)

    fwd = jax.jit(transformer_encoder, static_argnames=("num_heads",))
    out = fwd(x, params, num_heads=H)
    out = jax.block_until_ready(out)

    ref = _reference(x, params, H)
    assert out.shape == (B, N, C)
    # bf16 matmul operands (f32 accumulation) + tanh-GELU -> loosened tolerance.
    assert jnp.allclose(out, ref, atol=5e-2, rtol=5e-2), (
        f"mismatch vs reference, max abs err {jnp.max(jnp.abs(out - ref))}")

    print("KERNEL_OK")
</pallas_src>

<mosaic_0001>
module attributes {stable_mosaic.version = 11 : i64} {
  func.func @_ln_qkv_kernel(%arg0: i32, %arg1: memref<16x32xf32, #tpu.memory_space<vmem>>, %arg2: memref<1x32xf32, #tpu.memory_space<vmem>>, %arg3: memref<1x32xf32, #tpu.memory_space<vmem>>, %arg4: memref<32x96xbf16, #tpu.memory_space<vmem>>, %arg5: memref<1x96xf32, #tpu.memory_space<vmem>>, %arg6: memref<16x96xbf16, #tpu.memory_space<vmem>>) attributes {dimension_semantics = [#tpu.dimension_semantics<parallel>], iteration_bounds = array<i64: 1>, scalar_prefetch = 0 : i64, scratch_operands = 0 : i64, tpu.core_type = #tpu.core_type<tc>, window_params = [{transform_indices = @transform_0, window_bounds = array<i64: 16, 32>}, {pipeline_mode = #tpu.pipeline_mode<synchronous>, transform_indices = @transform_1, window_bounds = array<i64: 1, 32>}, {pipeline_mode = #tpu.pipeline_mode<synchronous>, transform_indices = @transform_2, window_bounds = array<i64: 1, 32>}, {pipeline_mode = #tpu.pipeline_mode<synchronous>, transform_indices = @transform_3, window_bounds = array<i64: 32, 96>}, {pipeline_mode = #tpu.pipeline_mode<synchronous>, transform_indices = @transform_4, window_bounds = array<i64: 1, 96>}, {transform_indices = @transform_5, window_bounds = array<i64: 16, 96>}]} {
    %c0 = arith.constant 0 : index
    %c0_0 = arith.constant 0 : index
    %0 = vector.load %arg1[%c0, %c0_0] : memref<16x32xf32, #tpu.memory_space<vmem>>, vector<16x32xf32>
    %cst = arith.constant dense<0.000000e+00> : vector<16xf32>
    %1 = vector.multi_reduction <add>, %0, %cst [1] : vector<16x32xf32> to vector<16xf32>
    %2 = vector.shape_cast %1 : vector<16xf32> to vector<16x1xf32>
    %cst_1 = arith.constant 3.200000e+01 : f32
    %3 = vector.broadcast %cst_1 : f32 to vector<16x1xf32>
    %4 = arith.divf %2, %3 : vector<16x1xf32>
    %5 = vector.broadcast %4 : vector<16x1xf32> to vector<16x32xf32>
    %6 = arith.subf %0, %5 : vector<16x32xf32>
    %7 = arith.mulf %6, %6 : vector<16x32xf32>
    %cst_2 = arith.constant dense<0.000000e+00> : vector<16xf32>
    %8 = vector.multi_reduction <add>, %7, %cst_2 [1] : vector<16x32xf32> to vector<16xf32>
    %9 = vector.shape_cast %8 : vector<16xf32> to vector<16x1xf32>
    %cst_3 = arith.constant 3.200000e+01 : f32
    %10 = vector.broadcast %cst_3 : f32 to vector<16x1xf32>
    %11 = arith.divf %9, %10 : vector<16x1xf32>
    %cst_4 = arith.constant 9.99999974E-6 : f32
    %12 = vector.broadcast %cst_4 : f32 to vector<16x1xf32>
    %13 = arith.addf %11, %12 : vector<16x1xf32>
    %14 = math.rsqrt %13 : vector<16x1xf32>
    %15 = vector.broadcast %14 : vector<16x1xf32> to vector<16x32xf32>
    %16 = arith.mulf %6, %15 : vector<16x32xf32>
    %c0_5 = arith.constant 0 : index
    %c0_6 = arith.constant 0 : index
    %17 = vector.load %arg2[%c0_5, %c0_6] : memref<1x32xf32, #tpu.memory_space<vmem>>, vector<1x32xf32>
    %18 = vector.broadcast %17 : vector<1x32xf32> to vector<16x32xf32>
    %19 = arith.mulf %16, %18 : vector<16x32xf32>
    %c0_7 = arith.constant 0 : index
    %c0_8 = arith.constant 0 : index
    %20 = vector.load %arg3[%c0_7, %c0_8] : memref<1x32xf32, #tpu.memory_space<vmem>>, vector<1x32xf32>
    %21 = vector.broadcast %20 : vector<1x32xf32> to vector<16x32xf32>
    %22 = arith.addf %19, %21 : vector<16x32xf32>
    %23 = arith.truncf %22 : vector<16x32xf32> to vector<16x32xbf16>
    %c0_9 = arith.constant 0 : index
    %c0_10 = arith.constant 0 : index
    %24 = vector.load %arg4[%c0_9, %c0_10] : memref<32x96xbf16, #tpu.memory_space<vmem>>, vector<32x96xbf16>
    %cst_11 = arith.constant dense<0.000000e+00> : vector<16x96xf32>
    %25 = tpu.matmul %23, %24, %cst_11 {dimension_numbers = #tpu.dot_dimension_numbers<[1], [0], [0], [1], [0, 0, 1, 1], [], []>} : vector<16x32xbf16>, vector<32x96xbf16>, vector<16x96xf32> -> vector<16x96xf32>
    %c0_12 = arith.constant 0 : index
    %c0_13 = arith.constant 0 : index
    %26 = vector.load %arg5[%c0_12, %c0_13] : memref<1x96xf32, #tpu.memory_space<vmem>>, vector<1x96xf32>
    %27 = vector.broadcast %26 : vector<1x96xf32> to vector<16x96xf32>
    %28 = arith.addf %25, %27 : vector<16x96xf32>
    %29 = arith.truncf %28 : vector<16x96xf32> to vector<16x96xbf16>
    %c0_14 = arith.constant 0 : index
    %c0_15 = arith.constant 0 : index
    %30 = vector.load %arg6[%c0_14, %c0_15] : memref<16x96xbf16, #tpu.memory_space<vmem>>, vector<16x96xbf16>
    tpu.vector_store %arg6[%c0_14, %c0_15], %29 {strides = array<i32>} : memref<16x96xbf16, #tpu.memory_space<vmem>>, vector<16x96xbf16>,
    return
  }
  func.func @transform_0(%arg0: i32) -> (i32, i32) {
    %c0_i32 = arith.constant 0 : i32
    %c0_i32_0 = arith.constant 0 : i32
    return %arg0, %c0_i32 : i32, i32
  }
  func.func @transform_1(%arg0: i32) -> (i32, i32) {
    %c0_i32 = arith.constant 0 : i32
    %c0_i32_0 = arith.constant 0 : i32
    %c0_i32_1 = arith.constant 0 : i32
    return %c0_i32, %c0_i32_0 : i32, i32
  }
  func.func @transform_2(%arg0: i32) -> (i32, i32) {
    %c0_i32 = arith.constant 0 : i32
    %c0_i32_0 = arith.constant 0 : i32
    %c0_i32_1 = arith.constant 0 : i32
    return %c0_i32, %c0_i32_0 : i32, i32
  }
  func.func @transform_3(%arg0: i32) -> (i32, i32) {
    %c0_i32 = arith.constant 0 : i32
    %c0_i32_0 = arith.constant 0 : i32
    %c0_i32_1 = arith.constant 0 : i32
    return %c0_i32, %c0_i32_0 : i32, i32
  }
  func.func @transform_4(%arg0: i32) -> (i32, i32) {
    %c0_i32 = arith.constant 0 : i32
    %c0_i32_0 = arith.constant 0 : i32
    %c0_i32_1 = arith.constant 0 : i32
    return %c0_i32, %c0_i32_0 : i32, i32
  }
  func.func @transform_5(%arg0: i32) -> (i32, i32) {
    %c0_i32 = arith.constant 0 : i32
    %c0_i32_0 = arith.constant 0 : i32
    return %arg0, %c0_i32 : i32, i32
  }
}

module attributes {stable_mosaic.version = 11 : i64} {
  func.func @_mlp_kernel(%arg0: i32, %arg1: i32, %arg2: memref<16x32xf32, #tpu.memory_space<vmem>>, %arg3: memref<1x32xf32, #tpu.memory_space<vmem>>, %arg4: memref<1x32xf32, #tpu.memory_space<vmem>>, %arg5: memref<32x128xbf16, #tpu.memory_space<vmem>>, %arg6: memref<1x128xf32, #tpu.memory_space<vmem>>, %arg7: memref<128x32xbf16, #tpu.memory_space<vmem>>, %arg8: memref<1x32xf32, #tpu.memory_space<vmem>>, %arg9: memref<16x32xf32, #tpu.memory_space<vmem>>, %arg10: memref<16x32xf32, #tpu.memory_space<vmem>>, %arg11: memref<16x32xbf16, #tpu.memory_space<vmem>>) attributes {dimension_semantics = [#tpu.dimension_semantics<parallel>, #tpu.dimension_semantics<arbitrary>], iteration_bounds = array<i64: 1, 1>, scalar_prefetch = 0 : i64, scratch_operands = 2 : i64, tpu.core_type = #tpu.core_type<tc>, window_params = [{transform_indices = @transform_0, window_bounds = array<i64: 16, 32>}, {pipeline_mode = #tpu.pipeline_mode<synchronous>, transform_indices = @transform_1, window_bounds = array<i64: 1, 32>}, {pipeline_mode = #tpu.pipeline_mode<synchronous>, transform_indices = @transform_2, window_bounds = array<i64: 1, 32>}, {transform_indices = @transform_3, window_bounds = array<i64: 32, 128>}, {transform_indices = @transform_4, window_bounds = array<i64: 1, 128>}, {transform_indices = @transform_5, window_bounds = array<i64: 128, 32>}, {pipeline_mode = #tpu.pipeline_mode<synchronous>, transform_indices = @transform_6, window_bounds = array<i64: 1, 32>}, {transform_indices = @transform_7, window_bounds = array<i64: 16, 32>}]} {
    %c0_i32 = arith.constant 0 : i32
    %0 = arith.cmpi eq, %arg1, %c0_i32 : i32
    %1 = arith.extui %0 : i1 to i32
    %c0_i32_0 = arith.constant 0 : i32
    %2 = arith.cmpi ne, %1, %c0_i32_0 : i32
    scf.if %2 {
      %c0_19 = arith.constant 0 : index
      %c0_20 = arith.constant 0 : index
      %31 = vector.load %arg2[%c0_19, %c0_20] : memref<16x32xf32, #tpu.memory_space<vmem>>, vector<16x32xf32>
      %cst_21 = arith.constant dense<0.000000e+00> : vector<16xf32>
      %32 = vector.multi_reduction <add>, %31, %cst_21 [1] : vector<16x32xf32> to vector<16xf32>
      %33 = vector.shape_cast %32 : vector<16xf32> to vector<16x1xf32>
      %cst_22 = arith.constant 3.200000e+01 : f32
      %34 = vector.broadcast %cst_22 : f32 to vector<16x1xf32>
      %35 = arith.divf %33, %34 : vector<16x1xf32>
      %36 = vector.broadcast %35 : vector<16x1xf32> to vector<16x32xf32>
      %37 = arith.subf %31, %36 : vector<16x32xf32>
      %38 = arith.mulf %37, %37 : vector<16x32xf32>
      %cst_23 = arith.constant dense<0.000000e+00> : vector<16xf32>
      %39 = vector.multi_reduction <add>, %38, %cst_23 [1] : vector<16x32xf32> to vector<16xf32>
      %40 = vector.shape_cast %39 : vector<16xf32> to vector<16x1xf32>
      %cst_24 = arith.constant 3.200000e+01 : f32
      %41 = vector.broadcast %cst_24 : f32 to vector<16x1xf32>
      %42 = arith.divf %40, %41 : vector<16x1xf32>
      %cst_25 = arith.constant 9.99999974E-6 : f32
      %43 = vector.broadcast %cst_25 : f32 to vector<16x1xf32>
      %44 = arith.addf %42, %43 : vector<16x1xf32>
      %45 = math.rsqrt %44 : vector<16x1xf32>
      %46 = vector.broadcast %45 : vector<16x1xf32> to vector<16x32xf32>
      %47 = arith.mulf %37, %46 : vector<16x32xf32>
      %c0_26 = arith.constant 0 : index
      %c0_27 = arith.constant 0 : index
      %48 = vector.load %arg3[%c0_26, %c0_27] : memref<1x32xf32, #tpu.memory_space<vmem>>, vector<1x32xf32>
      %49 = vector.broadcast %48 : vector<1x32xf32> to vector<16x32xf32>
      %50 = arith.mulf %47, %49 : vector<16x32xf32>
      %c0_28 = arith.constant 0 : index
      %c0_29 = arith.constant 0 : index
      %51 = vector.load %arg4[%c0_28, %c0_29] : memref<1x32xf32, #tpu.memory_space<vmem>>, vector<1x32xf32>
      %52 = vector.broadcast %51 : vector<1x32xf32> to vector<16x32xf32>
      %53 = arith.addf %50, %52 : vector<16x32xf32>
      %54 = arith.truncf %53 : vector<16x32xf32> to vector<16x32xbf16>
      %c0_30 = arith.constant 0 : index
      %c0_31 = arith.constant 0 : index
      %55 = vector.load %arg11[%c0_30, %c0_31] : memref<16x32xbf16, #tpu.memory_space<vmem>>, vector<16x32xbf16>
      tpu.vector_store %arg11[%c0_30, %c0_31], %54 {strides = array<i32>} : memref<16x32xbf16, #tpu.memory_space<vmem>>, vector<16x32xbf16>,
      %cst_32 = arith.constant 0.000000e+00 : f32
      %56 = vector.broadcast %cst_32 : f32 to vector<16x32xf32>
      %c0_33 = arith.constant 0 : index
      %c0_34 = arith.constant 0 : index
      %57 = vector.load %arg10[%c0_33, %c0_34] : memref<16x32xf32, #tpu.memory_space<vmem>>, vector<16x32xf32>
      tpu.vector_store %arg10[%c0_33, %c0_34], %56 {strides = array<i32>} : memref<16x32xf32, #tpu.memory_space<vmem>>, vector<16x32xf32>,
    } else {
    }
    %c0 = arith.constant 0 : index
    %c0_1 = arith.constant 0 : index
    %3 = vector.load %arg11[%c0, %c0_1] : memref<16x32xbf16, #tpu.memory_space<vmem>>, vector<16x32xbf16>
    %c0_2 = arith.constant 0 : index
    %c0_3 = arith.constant 0 : index
    %4 = vector.load %arg5[%c0_2, %c0_3] : memref<32x128xbf16, #tpu.memory_space<vmem>>, vector<32x128xbf16>
    %cst = arith.constant dense<0.000000e+00> : vector<16x128xf32>
    %5 = tpu.matmul %3, %4, %cst {dimension_numbers = #tpu.dot_dimension_numbers<[1], [0], [0], [1], [0, 0, 1, 1], [], []>} : vector<16x32xbf16>, vector<32x128xbf16>, vector<16x128xf32> -> vector<16x128xf32>
    %c0_4 = arith.constant 0 : index
    %c0_5 = arith.constant 0 : index
    %6 = vector.load %arg6[%c0_4, %c0_5] : memref<1x128xf32, #tpu.memory_space<vmem>>, vector<1x128xf32>
    %7 = vector.broadcast %6 : vector<1x128xf32> to vector<16x128xf32>
    %8 = arith.addf %5, %7 : vector<16x128xf32>
    %9 = arith.mulf %8, %8 : vector<16x128xf32>
    %10 = arith.mulf %8, %9 : vector<16x128xf32>
    %cst_6 = arith.constant 4.471500e-02 : f32
    %11 = vector.broadcast %cst_6 : f32 to vector<16x128xf32>
    %12 = arith.mulf %11, %10 : vector<16x128xf32>
    %13 = arith.addf %8, %12 : vector<16x128xf32>
    %cst_7 = arith.constant 0.797884583 : f32
    %14 = vector.broadcast %cst_7 : f32 to vector<16x128xf32>
    %15 = arith.mulf %14, %13 : vector<16x128xf32>
    %16 = math.tanh %15 : vector<16x128xf32>
    %cst_8 = arith.constant 1.000000e+00 : f32
    %17 = vector.broadcast %cst_8 : f32 to vector<16x128xf32>
    %18 = arith.addf %17, %16 : vector<16x128xf32>
    %cst_9 = arith.constant 5.000000e-01 : f32
    %19 = vector.broadcast %cst_9 : f32 to vector<16x128xf32>
    %20 = arith.mulf %19, %18 : vector<16x128xf32>
    %21 = arith.mulf %8, %20 : vector<16x128xf32>
    %c0_10 = arith.constant 0 : index
    %c0_11 = arith.constant 0 : index
    %22 = vector.load %arg10[%c0_10, %c0_11] : memref<16x32xf32, #tpu.memory_space<vmem>>, vector<16x32xf32>
    %23 = arith.truncf %21 : vector<16x128xf32> to vector<16x128xbf16>
    %c0_12 = arith.constant 0 : index
    %c0_13 = arith.constant 0 : index
    %24 = vector.load %arg7[%c0_12, %c0_13] : memref<128x32xbf16, #tpu.memory_space<vmem>>, vector<128x32xbf16>
    %cst_14 = arith.constant dense<0.000000e+00> : vector<16x32xf32>
    %25 = tpu.matmul %23, %24, %cst_14 {dimension_numbers = #tpu.dot_dimension_numbers<[1], [0], [0], [1], [0, 0, 1, 1], [], []>} : vector<16x128xbf16>, vector<128x32xbf16>, vector<16x32xf32> -> vector<16x32xf32>
    %26 = arith.addf %22, %25 : vector<16x32xf32>
    %c0_15 = arith.constant 0 : index
    %c0_16 = arith.constant 0 : index
    %27 = vector.load %arg10[%c0_15, %c0_16] : memref<16x32xf32, #tpu.memory_space<vmem>>, vector<16x32xf32>
    tpu.vector_store %arg10[%c0_15, %c0_16], %26 {strides = array<i32>} : memref<16x32xf32, #tpu.memory_space<vmem>>, vector<16x32xf32>,
    %c0_i32_17 = arith.constant 0 : i32
    %28 = arith.cmpi eq, %arg1, %c0_i32_17 : i32
    %29 = arith.extui %28 : i1 to i32
    %c0_i32_18 = arith.constant 0 : i32
    %30 = arith.cmpi ne, %29, %c0_i32_18 : i32
    scf.if %30 {
      %c0_19 = arith.constant 0 : index
      %c0_20 = arith.constant 0 : index
      %31 = vector.load %arg2[%c0_19, %c0_20] : memref<16x32xf32, #tpu.memory_space<vmem>>, vector<16x32xf32>
      %c0_21 = arith.constant 0 : index
      %c0_22 = arith.constant 0 : index
      %32 = vector.load %arg10[%c0_21, %c0_22] : memref<16x32xf32, #tpu.memory_space<vmem>>, vector<16x32xf32>
      %33 = arith.addf %31, %32 : vector<16x32xf32>
      %c0_23 = arith.constant 0 : index
      %c0_24 = arith.constant 0 : index
      %34 = vector.load %arg8[%c0_23, %c0_24] : memref<1x32xf32, #tpu.memory_space<vmem>>, vector<1x32xf32>
      %35 = vector.broadcast %34 : vector<1x32xf32> to vector<16x32xf32>
      %36 = arith.addf %33, %35 : vector<16x32xf32>
      %c0_25 = arith.constant 0 : index
      %c0_26 = arith.constant 0 : index
      %37 = vector.load %arg9[%c0_25, %c0_26] : memref<16x32xf32, #tpu.memory_space<vmem>>, vector<16x32xf32>
      tpu.vector_store %arg9[%c0_25, %c0_26], %36 {strides = array<i32>} : memref<16x32xf32, #tpu.memory_space<vmem>>, vector<16x32xf32>,
    } else {
    }
    return
  }
  func.func @transform_0(%arg0: i32, %arg1: i32) -> (i32, i32) {
    %c0_i32 = arith.constant 0 : i32
    %c0_i32_0 = arith.constant 0 : i32
    return %arg0, %c0_i32 : i32, i32
  }
  func.func @transform_1(%arg0: i32, %arg1: i32) -> (i32, i32) {
    %c0_i32 = arith.constant 0 : i32
    %c0_i32_0 = arith.constant 0 : i32
    %c0_i32_1 = arith.constant 0 : i32
    return %c0_i32, %c0_i32_0 : i32, i32
  }
  func.func @transform_2(%arg0: i32, %arg1: i32) -> (i32, i32) {
    %c0_i32 = arith.constant 0 : i32
    %c0_i32_0 = arith.constant 0 : i32
    %c0_i32_1 = arith.constant 0 : i32
    return %c0_i32, %c0_i32_0 : i32, i32
  }
  func.func @transform_3(%arg0: i32, %arg1: i32) -> (i32, i32) {
    %c0_i32 = arith.constant 0 : i32
    %c0_i32_0 = arith.constant 0 : i32
    return %c0_i32, %arg1 : i32, i32
  }
  func.func @transform_4(%arg0: i32, %arg1: i32) -> (i32, i32) {
    %c0_i32 = arith.constant 0 : i32
    %c0_i32_0 = arith.constant 0 : i32
    return %c0_i32, %arg1 : i32, i32
  }
  func.func @transform_5(%arg0: i32, %arg1: i32) -> (i32, i32) {
    %c0_i32 = arith.constant 0 : i32
    %c0_i32_0 = arith.constant 0 : i32
    return %arg1, %c0_i32 : i32, i32
  }
  func.func @transform_6(%arg0: i32, %arg1: i32) -> (i32, i32) {
    %c0_i32 = arith.constant 0 : i32
    %c0_i32_0 = arith.constant 0 : i32
    %c0_i32_1 = arith.constant 0 : i32
    return %c0_i32, %c0_i32_0 : i32, i32
  }
  func.func @transform_7(%arg0: i32, %arg1: i32) -> (i32, i32) {
    %c0_i32 = arith.constant 0 : i32
    %c0_i32_0 = arith.constant 0 : i32
    return %arg0, %c0_i32 : i32, i32
  }
}

module attributes {stable_mosaic.version = 11 : i64} {
  func.func @kernel(%arg0: i32, %arg1: memref<1x8x32xf32, #tpu.memory_space<vmem>>, %arg2: memref<1x8x96xbf16, #tpu.memory_space<vmem>>, %arg3: memref<32x32xbf16, #tpu.memory_space<vmem>>, %arg4: memref<1x32xf32, #tpu.memory_space<vmem>>, %arg5: memref<1x8x32xf32, #tpu.memory_space<vmem>>, %arg6: memref<8x32xbf16, #tpu.memory_space<vmem>>) attributes {dimension_semantics = [#tpu.dimension_semantics<parallel>], iteration_bounds = array<i64: 2>, scalar_prefetch = 0 : i64, scratch_operands = 1 : i64, tpu.core_type = #tpu.core_type<tc>, window_params = [{transform_indices = @transform_0, window_bounds = array<i64: 1, 8, 32>}, {transform_indices = @transform_1, window_bounds = array<i64: 1, 8, 96>}, {pipeline_mode = #tpu.pipeline_mode<synchronous>, transform_indices = @transform_2, window_bounds = array<i64: 32, 32>}, {pipeline_mode = #tpu.pipeline_mode<synchronous>, transform_indices = @transform_3, window_bounds = array<i64: 1, 32>}, {transform_indices = @transform_4, window_bounds = array<i64: 1, 8, 32>}]} {
    %c0 = arith.constant 0 : index
    %c0_0 = arith.constant 0 : index
    %c0_1 = arith.constant 0 : index
    %0 = vector.load %arg2[%c0, %c0_0, %c0_1] : memref<1x8x96xbf16, #tpu.memory_space<vmem>>, vector<1x8x96xbf16>
    %1 = vector.shape_cast %0 : vector<1x8x96xbf16> to vector<8x96xbf16>
    %2 = vector.extract_strided_slice %1 {offsets = [0, 0], sizes = [8, 8], strides = [1, 1]} : vector<8x96xbf16> to vector<8x8xbf16>
    %3 = vector.extract_strided_slice %1 {offsets = [0, 32], sizes = [8, 8], strides = [1, 1]} : vector<8x96xbf16> to vector<8x8xbf16>
    %4 = vector.extract_strided_slice %1 {offsets = [0, 64], sizes = [8, 8], strides = [1, 1]} : vector<8x96xbf16> to vector<8x8xbf16>
    %cst = arith.constant dense<0.000000e+00> : vector<8x8xf32>
    %5 = tpu.matmul %2, %3, %cst {dimension_numbers = #tpu.dot_dimension_numbers<[1], [1], [0], [0], [0, 0, 1, 0], [], []>} : vector<8x8xbf16>, vector<8x8xbf16>, vector<8x8xf32> -> vector<8x8xf32>
    %cst_2 = arith.constant 0.353553385 : f32
    %6 = vector.broadcast %cst_2 : f32 to vector<8x8xf32>
    %7 = arith.mulf %5, %6 : vector<8x8xf32>
    %cst_3 = arith.constant dense<0xFF800000> : vector<8xf32>
    %8 = vector.multi_reduction <maximumf>, %7, %cst_3 [1] : vector<8x8xf32> to vector<8xf32>
    %9 = vector.shape_cast %8 : vector<8xf32> to vector<8x1xf32>
    %10 = vector.broadcast %9 : vector<8x1xf32> to vector<8x8xf32>
    %11 = arith.subf %7, %10 : vector<8x8xf32>
    %12 = math.exp %11 : vector<8x8xf32>
    %cst_4 = arith.constant dense<0.000000e+00> : vector<8xf32>
    %13 = vector.multi_reduction <add>, %12, %cst_4 [1] : vector<8x8xf32> to vector<8xf32>
    %14 = vector.shape_cast %13 : vector<8xf32> to vector<8x1xf32>
    %15 = tpu.reciprocal %14 {approx = true} : vector<8x1xf32> -> vector<8x1xf32>
    %16 = vector.broadcast %15 : vector<8x1xf32> to vector<8x8xf32>
    %17 = arith.mulf %12, %16 : vector<8x8xf32>
    %18 = arith.truncf %17 : vector<8x8xf32> to vector<8x8xbf16>
    %cst_5 = arith.constant dense<0.000000e+00> : vector<8x8xf32>
    %19 = tpu.matmul %18, %4, %cst_5 {dimension_numbers = #tpu.dot_dimension_numbers<[1], [0], [0], [1], [0, 0, 1, 1], [], []>} : vector<8x8xbf16>, vector<8x8xbf16>, vector<8x8xf32> -> vector<8x8xf32>
    %20 = arith.truncf %19 : vector<8x8xf32> to vector<8x8xbf16>
    %c0_6 = arith.constant 0 : index
    %c0_7 = arith.constant 0 : index
    %21 = vector.load %arg6[%c0_6, %c0_7] : memref<8x32xbf16, #tpu.memory_space<vmem>>, vector<8x8xbf16>
    tpu.vector_store %arg6[%c0_6, %c0_7], %20 {strides = array<i32>} : memref<8x32xbf16, #tpu.memory_space<vmem>>, vector<8x8xbf16>,
    %22 = vector.extract_strided_slice %1 {offsets = [0, 8], sizes = [8, 8], strides = [1, 1]} : vector<8x96xbf16> to vector<8x8xbf16>
    %23 = vector.extract_strided_slice %1 {offsets = [0, 40], sizes = [8, 8], strides = [1, 1]} : vector<8x96xbf16> to vector<8x8xbf16>
    %24 = vector.extract_strided_slice %1 {offsets = [0, 72], sizes = [8, 8], strides = [1, 1]} : vector<8x96xbf16> to vector<8x8xbf16>
    %cst_8 = arith.constant dense<0.000000e+00> : vector<8x8xf32>
    %25 = tpu.matmul %22, %23, %cst_8 {dimension_numbers = #tpu.dot_dimension_numbers<[1], [1], [0], [0], [0, 0, 1, 0], [], []>} : vector<8x8xbf16>, vector<8x8xbf16>, vector<8x8xf32> -> vector<8x8xf32>
    %cst_9 = arith.constant 0.353553385 : f32
    %26 = vector.broadcast %cst_9 : f32 to vector<8x8xf32>
    %27 = arith.mulf %25, %26 : vector<8x8xf32>
    %cst_10 = arith.constant dense<0xFF800000> : vector<8xf32>
    %28 = vector.multi_reduction <maximumf>, %27, %cst_10 [1] : vector<8x8xf32> to vector<8xf32>
    %29 = vector.shape_cast %28 : vector<8xf32> to vector<8x1xf32>
    %30 = vector.broadcast %29 : vector<8x1xf32> to vector<8x8xf32>
    %31 = arith.subf %27, %30 : vector<8x8xf32>
    %32 = math.exp %31 : vector<8x8xf32>
    %cst_11 = arith.constant dense<0.000000e+00> : vector<8xf32>
    %33 = vector.multi_reduction <add>, %32, %cst_11 [1] : vector<8x8xf32> to vector<8xf32>
    %34 = vector.shape_cast %33 : vector<8xf32> to vector<8x1xf32>
    %35 = tpu.reciprocal %34 {approx = true} : vector<8x1xf32> -> vector<8x1xf32>
    %36 = vector.broadcast %35 : vector<8x1xf32> to vector<8x8xf32>
    %37 = arith.mulf %32, %36 : vector<8x8xf32>
    %38 = arith.truncf %37 : vector<8x8xf32> to vector<8x8xbf16>
    %cst_12 = arith.constant dense<0.000000e+00> : vector<8x8xf32>
    %39 = tpu.matmul %38, %24, %cst_12 {dimension_numbers = #tpu.dot_dimension_numbers<[1], [0], [0], [1], [0, 0, 1, 1], [], []>} : vector<8x8xbf16>, vector<8x8xbf16>, vector<8x8xf32> -> vector<8x8xf32>
    %40 = arith.truncf %39 : vector<8x8xf32> to vector<8x8xbf16>
    %c0_13 = arith.constant 0 : index
    %c8 = arith.constant 8 : index
    %41 = vector.load %arg6[%c0_13, %c8] : memref<8x32xbf16, #tpu.memory_space<vmem>>, vector<8x8xbf16>
    tpu.vector_store %arg6[%c0_13, %c8], %40 {strides = array<i32>} : memref<8x32xbf16, #tpu.memory_space<vmem>>, vector<8x8xbf16>,
    %42 = vector.extract_strided_slice %1 {offsets = [0, 16], sizes = [8, 8], strides = [1, 1]} : vector<8x96xbf16> to vector<8x8xbf16>
    %43 = vector.extract_strided_slice %1 {offsets = [0, 48], sizes = [8, 8], strides = [1, 1]} : vector<8x96xbf16> to vector<8x8xbf16>
    %44 = vector.extract_strided_slice %1 {offsets = [0, 80], sizes = [8, 8], strides = [1, 1]} : vector<8x96xbf16> to vector<8x8xbf16>
    %cst_14 = arith.constant dense<0.000000e+00> : vector<8x8xf32>
    %45 = tpu.matmul %42, %43, %cst_14 {dimension_numbers = #tpu.dot_dimension_numbers<[1], [1], [0], [0], [0, 0, 1, 0], [], []>} : vector<8x8xbf16>, vector<8x8xbf16>, vector<8x8xf32> -> vector<8x8xf32>
    %cst_15 = arith.constant 0.353553385 : f32
    %46 = vector.broadcast %cst_15 : f32 to vector<8x8xf32>
    %47 = arith.mulf %45, %46 : vector<8x8xf32>
    %cst_16 = arith.constant dense<0xFF800000> : vector<8xf32>
    %48 = vector.multi_reduction <maximumf>, %47, %cst_16 [1] : vector<8x8xf32> to vector<8xf32>
    %49 = vector.shape_cast %48 : vector<8xf32> to vector<8x1xf32>
    %50 = vector.broadcast %49 : vector<8x1xf32> to vector<8x8xf32>
    %51 = arith.subf %47, %50 : vector<8x8xf32>
    %52 = math.exp %51 : vector<8x8xf32>
    %cst_17 = arith.constant dense<0.000000e+00> : vector<8xf32>
    %53 = vector.multi_reduction <add>, %52, %cst_17 [1] : vector<8x8xf32> to vector<8xf32>
    %54 = vector.shape_cast %53 : vector<8xf32> to vector<8x1xf32>
    %55 = tpu.reciprocal %54 {approx = true} : vector<8x1xf32> -> vector<8x1xf32>
    %56 = vector.broadcast %55 : vector<8x1xf32> to vector<8x8xf32>
    %57 = arith.mulf %52, %56 : vector<8x8xf32>
    %58 = arith.truncf %57 : vector<8x8xf32> to vector<8x8xbf16>
    %cst_18 = arith.constant dense<0.000000e+00> : vector<8x8xf32>
    %59 = tpu.matmul %58, %44, %cst_18 {dimension_numbers = #tpu.dot_dimension_numbers<[1], [0], [0], [1], [0, 0, 1, 1], [], []>} : vector<8x8xbf16>, vector<8x8xbf16>, vector<8x8xf32> -> vector<8x8xf32>
    %60 = arith.truncf %59 : vector<8x8xf32> to vector<8x8xbf16>
    %c0_19 = arith.constant 0 : index
    %c16 = arith.constant 16 : index
    %61 = vector.load %arg6[%c0_19, %c16] : memref<8x32xbf16, #tpu.memory_space<vmem>>, vector<8x8xbf16>
    tpu.vector_store %arg6[%c0_19, %c16], %60 {strides = array<i32>} : memref<8x32xbf16, #tpu.memory_space<vmem>>, vector<8x8xbf16>,
    %62 = vector.extract_strided_slice %1 {offsets = [0, 24], sizes = [8, 8], strides = [1, 1]} : vector<8x96xbf16> to vector<8x8xbf16>
    %63 = vector.extract_strided_slice %1 {offsets = [0, 56], sizes = [8, 8], strides = [1, 1]} : vector<8x96xbf16> to vector<8x8xbf16>
    %64 = vector.extract_strided_slice %1 {offsets = [0, 88], sizes = [8, 8], strides = [1, 1]} : vector<8x96xbf16> to vector<8x8xbf16>
    %cst_20 = arith.constant dense<0.000000e+00> : vector<8x8xf32>
    %65 = tpu.matmul %62, %63, %cst_20 {dimension_numbers = #tpu.dot_dimension_numbers<[1], [1], [0], [0], [0, 0, 1, 0], [], []>} : vector<8x8xbf16>, vector<8x8xbf16>, vector<8x8xf32> -> vector<8x8xf32>
    %cst_21 = arith.constant 0.353553385 : f32
    %66 = vector.broadcast %cst_21 : f32 to vector<8x8xf32>
    %67 = arith.mulf %65, %66 : vector<8x8xf32>
    %cst_22 = arith.constant dense<0xFF800000> : vector<8xf32>
    %68 = vector.multi_reduction <maximumf>, %67, %cst_22 [1] : vector<8x8xf32> to vector<8xf32>
    %69 = vector.shape_cast %68 : vector<8xf32> to vector<8x1xf32>
    %70 = vector.broadcast %69 : vector<8x1xf32> to vector<8x8xf32>
    %71 = arith.subf %67, %70 : vector<8x8xf32>
    %72 = math.exp %71 : vector<8x8xf32>
    %cst_23 = arith.constant dense<0.000000e+00> : vector<8xf32>
    %73 = vector.multi_reduction <add>, %72, %cst_23 [1] : vector<8x8xf32> to vector<8xf32>
    %74 = vector.shape_cast %73 : vector<8xf32> to vector<8x1xf32>
    %75 = tpu.reciprocal %74 {approx = true} : vector<8x1xf32> -> vector<8x1xf32>
    %76 = vector.broadcast %75 : vector<8x1xf32> to vector<8x8xf32>
    %77 = arith.mulf %72, %76 : vector<8x8xf32>
    %78 = arith.truncf %77 : vector<8x8xf32> to vector<8x8xbf16>
    %cst_24 = arith.constant dense<0.000000e+00> : vector<8x8xf32>
    %79 = tpu.matmul %78, %64, %cst_24 {dimension_numbers = #tpu.dot_dimension_numbers<[1], [0], [0], [1], [0, 0, 1, 1], [], []>} : vector<8x8xbf16>, vector<8x8xbf16>, vector<8x8xf32> -> vector<8x8xf32>
    %80 = arith.truncf %79 : vector<8x8xf32> to vector<8x8xbf16>
    %c0_25 = arith.constant 0 : index
    %c24 = arith.constant 24 : index
    %81 = vector.load %arg6[%c0_25, %c24] : memref<8x32xbf16, #tpu.memory_space<vmem>>, vector<8x8xbf16>
    tpu.vector_store %arg6[%c0_25, %c24], %80 {strides = array<i32>} : memref<8x32xbf16, #tpu.memory_space<vmem>>, vector<8x8xbf16>,
    %c0_26 = arith.constant 0 : index
    %c0_27 = arith.constant 0 : index
    %82 = vector.load %arg6[%c0_26, %c0_27] : memref<8x32xbf16, #tpu.memory_space<vmem>>, vector<8x32xbf16>
    %c0_28 = arith.constant 0 : index
    %c0_29 = arith.constant 0 : index
    %83 = vector.load %arg3[%c0_28, %c0_29] : memref<32x32xbf16, #tpu.memory_space<vmem>>, vector<32x32xbf16>
    %cst_30 = arith.constant dense<0.000000e+00> : vector<8x32xf32>
    %84 = tpu.matmul %82, %83, %cst_30 {dimension_numbers = #tpu.dot_dimension_numbers<[1], [0], [0], [1], [0, 0, 1, 1], [], []>} : vector<8x32xbf16>, vector<32x32xbf16>, vector<8x32xf32> -> vector<8x32xf32>
    %c0_31 = arith.constant 0 : index
    %c0_32 = arith.constant 0 : index
    %c0_33 = arith.constant 0 : index
    %85 = vector.load %arg1[%c0_31, %c0_32, %c0_33] : memref<1x8x32xf32, #tpu.memory_space<vmem>>, vector<1x8x32xf32>
    %86 = vector.shape_cast %85 : vector<1x8x32xf32> to vector<8x32xf32>
    %87 = arith.addf %86, %84 : vector<8x32xf32>
    %c0_34 = arith.constant 0 : index
    %c0_35 = arith.constant 0 : index
    %88 = vector.load %arg4[%c0_34, %c0_35] : memref<1x32xf32, #tpu.memory_space<vmem>>, vector<1x32xf32>
    %89 = vector.broadcast %88 : vector<1x32xf32> to vector<8x32xf32>
    %90 = arith.addf %87, %89 : vector<8x32xf32>
    %c0_36 = arith.constant 0 : index
    %c0_37 = arith.constant 0 : index
    %c0_38 = arith.constant 0 : index
    %91 = vector.load %arg5[%c0_36, %c0_37, %c0_38] : memref<1x8x32xf32, #tpu.memory_space<vmem>>, vector<1x8x32xf32>
    %92 = vector.shape_cast %91 : vector<1x8x32xf32> to vector<8x32xf32>
    %93 = vector.shape_cast %90 : vector<8x32xf32> to vector<1x8x32xf32>
    tpu.vector_store %arg5[%c0_36, %c0_37, %c0_38], %93 {strides = array<i32>} : memref<1x8x32xf32, #tpu.memory_space<vmem>>, vector<1x8x32xf32>,
    return
  }
  func.func @transform_0(%arg0: i32) -> (i32, i32, i32) {
    %c0_i32 = arith.constant 0 : i32
    %c0_i32_0 = arith.constant 0 : i32
    %c0_i32_1 = arith.constant 0 : i32
    return %arg0, %c0_i32, %c0_i32_0 : i32, i32, i32
  }
  func.func @transform_1(%arg0: i32) -> (i32, i32, i32) {
    %c0_i32 = arith.constant 0 : i32
    %c0_i32_0 = arith.constant 0 : i32
    %c0_i32_1 = arith.constant 0 : i32
    return %arg0, %c0_i32, %c0_i32_0 : i32, i32, i32
  }
  func.func @transform_2(%arg0: i32) -> (i32, i32) {
    %c0_i32 = arith.constant 0 : i32
    %c0_i32_0 = arith.constant 0 : i32
    %c0_i32_1 = arith.constant 0 : i32
    return %c0_i32, %c0_i32_0 : i32, i32
  }
  func.func @transform_3(%arg0: i32) -> (i32, i32) {
    %c0_i32 = arith.constant 0 : i32
    %c0_i32_0 = arith.constant 0 : i32
    %c0_i32_1 = arith.constant 0 : i32
    return %c0_i32, %c0_i32_0 : i32, i32
  }
  func.func @transform_4(%arg0: i32) -> (i32, i32, i32) {
    %c0_i32 = arith.constant 0 : i32
    %c0_i32_0 = arith.constant 0 : i32
    %c0_i32_1 = arith.constant 0 : i32
    return %arg0, %c0_i32, %c0_i32_0 : i32, i32, i32
  }
}

</mosaic_0001>

<bundles_post_ra>
// kernel: transformer_encoder.3
= control target key start
LH: loop header
LB: loop body
LE: loop exit
PB: predicated region body
PF: predicated region fallthrough
CT: control target
= control target key end

     0   :  { %vm23_vm0 = vcmask 261120   ;;  %v181_v15 = vmov 0.0   ;;  %vm182_vm1 = vmmov 0   ;;  %vm145_vm2 = vcmask 781312   ;;  %s245_s0 = inlined_call_operand.vmem [shape: f32[16,32], index: 0, kind: input, shape index: {}]   ;;  %s246_s3 = inlined_call_operand.vmem [shape: bf16[32,96], index: 3, kind: input, shape index: {}]   ;;  %s247_s1 = inlined_call_operand.vmem [shape: f32[1,32], index: 1, kind: input, shape index: {}]   ;;  %s248_s2 = inlined_call_operand.vmem [shape: f32[1,32], index: 2, kind: input, shape index: {}]   ;;  %s249_s4 = inlined_call_operand.vmem [shape: f32[1,96], index: 4, kind: input, shape index: {}]   ;;  %s250_s5 = inlined_call_operand.vmem [shape: bf16[16,96], index: 5, kind: output, shape index: {}]  }
   0x1   :  { %v21_v0 = vld [vmem:[%s245_s0] sm:$0xff]  ;;  %v22_v1 = vld [vmem:[%s245_s0 + $0x8] sm:$0xff]  ;;  %165 = vmatprep.subr.bf16.mxu0 %v181_v15  ;;  %169 = vmatprep.mubr.msk.bf16.mxu0 %vm182_vm1, %v181_v15 }
   0x2   :  { %v24_v2 = vsel %vm23_vm0, %v21_v0, 0.0  ;;  %v27_v3 = vsel %vm23_vm0, %v22_v1, 0.0  ;;  %v175_v14 = vld [vmem:[%s246_s3] sm:$0xff]   ;;  %v176_v16 = vld [vmem:[%s246_s3 + $0x8] sm:$0xff]  }
   0x3   :  { %25 = vadd.xlane.f32.xlu0 %v24_v2  ;;  %166 = vmatpush3.bf16.msra.mxu0 %v175_v14  ;;  %v152_v25 = vld [vmem:[%s247_s1] ss:$0 sm:$0xff] }
   0x4   :  { %167 = vmatprep.subr.bf16.mxu0 %v181_v15  ;;  %v153_v29 = vld [vmem:[%s248_s2] ss:$0 sm:$0xff] }
   0x5   :  { %v154_v34 = vld [vmem:[%s249_s4] ss:$0 sm:$0xff] }
   0x7   :  { %28 = vadd.xlane.f32.xlu0 %v27_v3  ;;  %168 = vmatpush3.bf16.msra.mxu0 %v176_v16 }
  0x90   :  { %v26_v4 = vpop.xlane.xlu0 %25 }
  0x91   :  { %v31_v5 = vmul.f32 0.03125, %v26_v4 }
  0x93   :  { %v33_v6 = vsub.f32 %v21_v0, %v31_v5 }
  0x94   :  { %v29_v7 = vpop.xlane.xlu0 %28 }
  0x95   :  { %v32_v8 = vmul.f32 0.03125, %v29_v7  ;;  %v35_v9 = vmul.f32 %v33_v6, %v33_v6 }
  0x97   :  { %v34_v10 = vsub.f32 %v22_v1, %v32_v8  ;;  %v37_v11 = vsel %vm23_vm0, %v35_v9, 0.0 }
  0x98   :  { %38 = vadd.xlane.f32.xlu1 %v37_v11 }
  0x99   :  { %v36_v12 = vmul.f32 %v34_v10, %v34_v10 }
  0x9b   :  { %v40_v13 = vsel %vm23_vm0, %v36_v12, 0.0 }
  0x9c   :  { %41 = vadd.xlane.f32.xlu1 %v40_v13 }
 0x125   :  { %v39_v17 = vpop.xlane.xlu1 %38 }
 0x126   :  { %v43_v18 = vmul.f32 0.03125, %v39_v17 }
 0x128   :  { %v45_v19 = vadd.f32 1e-05, %v43_v18 }
 0x129   :  { %v42_v20 = vpop.xlane.xlu1 %41 }
 0x12a   :  { %177 = vrsqrt.f32 %v45_v19  ;;  %v44_v21 = vmul.f32 0.03125, %v42_v20 }
 0x12c   :  { %v46_v22 = vadd.f32 1e-05, %v44_v21 }
 0x12e   :  { %179 = vrsqrt.f32 %v46_v22 }
 0x134   :  { %v178_v23 = vpop.eup %177 }
 0x135   :  { %v49_v24 = vmul.f32 %v178_v23, %v33_v6 }
 0x137   :  { %v58_v28 = vmul.f32 %v152_v25, %v49_v24 }
 0x138   :  { %v180_v26 = vpop.eup %179 }
 0x139   :  { %v50_v27 = vmul.f32 %v180_v26, %v34_v10  ;;  %v67_v31 = vadd.f32 %v153_v29, %v58_v28 }
 0x13b   :  { %v59_v30 = vmul.f32 %v152_v25, %v50_v27 }
 0x13d   :  { %v68_v32 = vadd.f32 %v153_v29, %v59_v30 }
 0x13f   :  { %v69_v33 = vpack.c.bf16 %v68_v32, %v67_v31 }
 0x141   :  { %170 = vmatmul.mubr.msk.bf16.vlgmr.msra.gmra.mrb[0].mxu0 %vm23_vm0, %v69_v33 }
 0x214   :  { %v130_v35 = vpop.f32.mrb[0].mxu0 }
 0x215   :  { %v131_v36 = vadd.f32 %v154_v34, %v130_v35  ;;  %v171_v37 = vpop.f32.mrb[1].mxu0 }
 0x216   :  { %v133_v38 = vpop.f32.mrb[2].mxu0 }
 0x217   :  { %v160_v39 = vpack.c.bf16 %v131_v36, %v131_v36  ;;  %v134_v40 = vadd.f32 %v154_v34, %v133_v38  ;;  %v172_v41 = vpop.f32.mrb[3].mxu0 }
 0x219   :  { %146 = vst.msk [vmem:[%s250_s5] sm:$0xf] %vm145_vm2, %v160_v39  ;;  %v161_v42 = vpack.c.bf16 %v134_v40, %v134_v40 }
 0x21b   :  { %147 = vst.msk [vmem:[%s250_s5 + $0x4] sm:$0xf] %vm145_vm2, %v161_v42 }

// kernel: transformer_encoder.5
= control target key start
LH: loop header
LB: loop body
LE: loop exit
PB: predicated region body
PF: predicated region fallthrough
CT: control target
= control target key end

     0   :  { %vm34_vm0 = vcmask 261120   ;;  %s548_s0 = inlined_call_operand.vmem [shape: f32[16,32], index: 0, kind: input, shape index: {}]   ;;  %s549_s1 = inlined_call_operand.vmem [shape: f32[1,32], index: 1, kind: input, shape index: {}]   ;;  %s550_s2 = inlined_call_operand.vmem [shape: f32[1,32], index: 2, kind: input, shape index: {}]   ;;  %s551_s3 = inlined_call_operand.vmem [shape: bf16[32,128], index: 3, kind: input, shape index: {}]   ;;  %s552_s4 = inlined_call_operand.vmem [shape: f32[1,128], index: 4, kind: input, shape index: {}]   ;;  %s553_s5 = inlined_call_operand.vmem [shape: bf16[128,32], index: 5, kind: input, shape index: {}]   ;;  %s554_s6 = inlined_call_operand.vmem [shape: f32[1,32], index: 6, kind: input, shape index: {}]   ;;  %s555_s7 = inlined_call_operand.hbm [shape: f32[16,32], index: 7, kind: output, shape index: {}]  }
   0x1   :  { %v469_v0 = vld [vmem:[%s548_s0] sm:$0xff]  ;;  %v474_v1 = vld [vmem:[%s548_s0 + $0x8] sm:$0xff] }
   0x2   :  { %v35_v2 = vsel %vm34_vm0, %v469_v0, 0.0  ;;  %v38_v3 = vsel %vm34_vm0, %v474_v1, 0.0 }
   0x3   :  { %36 = vadd.xlane.f32.xlu0 %v35_v2 }
   0x7   :  { %39 = vadd.xlane.f32.xlu0 %v38_v3 }
   0x8   :  { %12 = vsyncpa [#allocation5], 0  ;;  %v379_v14 = vld [vmem:[%s551_s3] sm:$0xff]   ;;  %v421_v15 = vmov 0.0   ;;  %v380_v16 = vld [vmem:[%s551_s3 + $0x8] sm:$0xff]   ;;  %vm422_vm1 = vmmov 0  }
   0x9   :  { %346 = vmatprep.subr.bf16.mxu0 %v421_v15  ;;  %82 = vst.msk [vmem:[#allocation2] sm:$0xff] %vm34_vm0, %v421_v15  ;;  %83 = vst.msk [vmem:[#allocation2 + $0x8] sm:$0xff] %vm34_vm0, %v421_v15  ;;  %354 = vmatprep.subr.bf16.mxu1 %v421_v15  ;;  %v319_v25 = vld [vmem:[%s549_s1] ss:$0 sm:$0xff]  ;;  %v382_v36 = vld [vmem:[%s553_s5 + $0x8] sm:$0xff]   ;;  %s423_s27 = smov [#allocation4]  }
   0xa   :  { %347 = vmatpush3.bf16.msra.mxu0 %v379_v14  ;;  %350 = vmatprep.mubr.msk.bf16.mxu0 %vm422_vm1, %v421_v15  ;;  %v320_v29 = vld [vmem:[%s550_s2] ss:$0 sm:$0xff]  ;;  %v383_v37 = vld [vmem:[%s553_s5 + $0x10] sm:$0xff]   ;;  %v384_v38 = vld [vmem:[%s553_s5 + $0x18] sm:$0xff]   ;;  %s308_s0 = sshll.u32 %s423_s27, 4  ;;  %s309_s0 = int_to_ptr.vmem [resolvable:$true] %s308_s0 }
   0xb   :  { %348 = vmatprep.subr.bf16.mxu0 %v421_v15  ;;  %370 = vmatprep.mubr.msk.bf16.mxu1 %vm422_vm1, %v421_v15  ;;  %v381_v35 = vld [vmem:[%s553_s5] sm:$0xff]   ;;  %v386_v40 = vld [vmem:[%s553_s5 + $0x28] sm:$0xff]   ;;  %v387_v41 = vld [vmem:[%s553_s5 + $0x30] sm:$0xff]   ;;  %s397_s28 = scalar_lea.vmem %s309_s0, 256  ;;  %p402_p1 = scmp.lt.s32.totalorder %s309_s0, %s309_s0 }
   0xc   :  { %355 = vmatpush3.bf16.msra.mxu1 %v381_v35  ;;  %v385_v39 = vld [vmem:[%s553_s5 + $0x20] sm:$0xff]   ;;  %v388_v42 = vld [vmem:[%s553_s5 + $0x38] sm:$0xff]   ;;  %p398_p0 = scmp.ne.s32.totalorder %s309_s0, %s397_s28  ;;  %p403_p2 = scmp.lt.s32.totalorder %s397_s28, %s397_s28 }
   0xd   :  { %356 = vmatprep.subr.bf16.mxu1 %v421_v15  ;;  %v321_v43 = vld [vmem:[%s552_s4] ss:$0 sm:$0xff] }
   0xe   :  { %349 = vmatpush3.bf16.msra.mxu0 %v380_v16  ;;  %v333_v16 = vld [vmem:[%s554_s6] ss:$0 sm:$0xff]  ;;  %p404_p3 = por %p403_p2, %p402_p1 }
  0x10   :  { %357 = vmatpush3.bf16.msra.mxu1 %v382_v36  ;;  %p405_p4 = pnand %p404_p3, %p398_p0 }
  0x11   :  { %358 = vmatprep.subr.bf16.mxu1 %v421_v15 }
  0x14   :  { %359 = vmatpush3.bf16.msra.mxu1 %v383_v37 }
  0x15   :  { %360 = vmatprep.subr.bf16.mxu1 %v421_v15 }
  0x18   :  { %361 = vmatpush3.bf16.msra.mxu1 %v384_v38 }
  0x19   :  { %362 = vmatprep.subr.bf16.mxu1 %v421_v15 }
  0x1c   :  { %363 = vmatpush3.bf16.msra.mxu1 %v385_v39 }
  0x1d   :  { %364 = vmatprep.subr.bf16.mxu1 %v421_v15 }
  0x20   :  { %365 = vmatpush3.bf16.msra.mxu1 %v386_v40 }
  0x21   :  { %366 = vmatprep.subr.bf16.mxu1 %v421_v15 }
  0x24   :  { %367 = vmatpush3.bf16.msra.mxu1 %v387_v41 }
  0x25   :  { %368 = vmatprep.subr.bf16.mxu1 %v421_v15 }
  0x28   :  { %369 = vmatpush3.bf16.msra.mxu1 %v388_v42 }
  0x90   :  { %v37_v4 = vpop.xlane.xlu0 %36 }
  0x91   :  { %v42_v5 = vmul.f32 0.03125, %v37_v4 }
  0x93   :  { %v44_v6 = vsub.f32 %v469_v0, %v42_v5 }
  0x94   :  { %v40_v7 = vpop.xlane.xlu0 %39 }
  0x95   :  { %v43_v8 = vmul.f32 0.03125, %v40_v7  ;;  %v46_v9 = vmul.f32 %v44_v6, %v44_v6  ;;  %v171_v7 = vld [vmem:[#allocation2] sm:$0xff] }
  0x97   :  { %v45_v10 = vsub.f32 %v474_v1, %v43_v8  ;;  %v48_v11 = vsel %vm34_vm0, %v46_v9, 0.0  ;;  %v172_v9 = vld [vmem:[#allocation2 + $0x8] sm:$0xff] }
  0x98   :  { %49 = vadd.xlane.f32.xlu1 %v48_v11 }
  0x99   :  { %v47_v12 = vmul.f32 %v45_v10, %v45_v10 }
  0x9b   :  { %v51_v13 = vsel %vm34_vm0, %v47_v12, 0.0 }
  0x9c   :  { %52 = vadd.xlane.f32.xlu1 %v51_v13 }
 0x125   :  { %v50_v17 = vpop.xlane.xlu1 %49 }
 0x126   :  { %v54_v18 = vmul.f32 0.03125, %v50_v17 }
 0x128   :  { %v56_v19 = vadd.f32 1e-05, %v54_v18 }
 0x129   :  { %v53_v20 = vpop.xlane.xlu1 %52 }
 0x12a   :  { %389 = vrsqrt.f32 %v56_v19  ;;  %v55_v21 = vmul.f32 0.03125, %v53_v20 }
 0x12c   :  { %v57_v22 = vadd.f32 1e-05, %v55_v21 }
 0x12e   :  { %391 = vrsqrt.f32 %v57_v22 }
 0x134   :  { %v390_v23 = vpop.eup %389 }
 0x135   :  { %v60_v24 = vmul.f32 %v390_v23, %v44_v6 }
 0x137   :  { %v69_v27 = vmul.f32 %v319_v25, %v60_v24 }
 0x138   :  { %v392_v26 = vpop.eup %391 }
 0x139   :  { %v61_v28 = vmul.f32 %v392_v26, %v45_v10  ;;  %v78_v31 = vadd.f32 %v320_v29, %v69_v27 }
 0x13b   :  { %v70_v30 = vmul.f32 %v319_v25, %v61_v28 }
 0x13d   :  { %v79_v32 = vadd.f32 %v320_v29, %v70_v30 }
 0x13f   :  { %v80_v33 = vpack.c.bf16 %v79_v32, %v78_v31 }
 0x141   :  { %81 = vst.msk [vmem:[#allocation3] sm:$0xff] %vm34_vm0, %v80_v33 }
 0x148   :  { %v84_v34 = vld [vmem:[#allocation3] sm:$0xff] }
 0x149   :  { %351 = vmatmul.mubr.msk.bf16.vlgmr.msra.gmra.mrb[0].mxu0 %vm34_vm0, %v84_v34 }
 0x21c   :  { %v146_v44 = vpop.f32.mrb[0].mxu0 }
 0x21d   :  { %v147_v45 = vadd.f32 %v321_v43, %v146_v44  ;;  %v352_v46 = vpop.f32.mrb[1].mxu0 }
 0x21e   :  { %v149_v47 = vpop.f32.mrb[2].mxu0 }
 0x21f   :  { %v153_v48 = vmul.f32 %v147_v45, %v147_v45  ;;  %v150_v49 = vadd.f32 %v321_v43, %v149_v47  ;;  %v353_v50 = vpop.f32.mrb[3].mxu0 }
 0x221   :  { %v155_v51 = vmul.f32 %v153_v48, %v147_v45  ;;  %v154_v52 = vmul.f32 %v150_v49, %v150_v49 }
 0x223   :  { %v157_v53 = vmul.f32 0.044715, %v155_v51  ;;  %v156_v54 = vmul.f32 %v154_v52, %v150_v49 }
 0x225   :  { %v159_v55 = vadd.f32 %v157_v53, %v147_v45  ;;  %v158_v56 = vmul.f32 0.044715, %v156_v54 }
 0x227   :  { %v161_v57 = vmul.f32 0.7978846, %v159_v55  ;;  %v160_v58 = vadd.f32 %v158_v56, %v150_v49 }
 0x229   :  { %393 = vtanh.f32 %v161_v57  ;;  %v162_v59 = vmul.f32 0.7978846, %v160_v58 }
 0x22b   :  { %395 = vtanh.f32 %v162_v59 }
 0x233   :  { %v394_v60 = vpop.eup %393 }
 0x234   :  { %v165_v61 = vadd.f32 1.0, %v394_v60 }
 0x235   :  { %v396_v62 = vpop.eup %395 }
 0x236   :  { %v166_v63 = vadd.f32 1.0, %v396_v62  ;;  %v167_v2 = vmul.f32 0.5, %v165_v61 }
 0x238   :  { %v168_v3 = vmul.f32 0.5, %v166_v63  ;;  %v169_v4 = vmul.f32 %v167_v2, %v147_v45 }
 0x23a   :  { %v170_v5 = vmul.f32 %v168_v3, %v150_v49 }
 0x23c   :  { %v173_v6 = vpack.c.bf16 %v170_v5, %v169_v4 }
 0x23e   :  { %371 = vmatmul.mubr.bf16.vlgmr.msra.gmra.mrb[0].mxu1 %v173_v6 }
 0x311   :  { %v272_v8 = vpop.f32.mrb[0].mxu1 }
 0x312   :  { %v279_v10 = vadd.f32 %v272_v8, %v171_v7  ;;  %v372_v11 = vpop.f32.mrb[1].mxu1 }
 0x313   :  { %v275_v12 = vpop.f32.mrb[2].mxu1 }
 0x314   :  { %281 = vst.msk [vmem:[#allocation2] sm:$0xff] %vm34_vm0, %v279_v10  ;;  %v280_v13 = vadd.f32 %v275_v12, %v172_v9  ;;  %v373_v14 = vpop.f32.mrb[3].mxu1 }
 0x316   :  { %282 = vst.msk [vmem:[#allocation2 + $0x8] sm:$0xff] %vm34_vm0, %v280_v13 }
 0x31b   :  { %v288_v15 = vld [vmem:[#allocation2] sm:$0xff] }
 0x31c   :  { %v290_v17 = vadd.f32 %v288_v15, %v469_v0 }
 0x31d   :  { %v289_v18 = vld [vmem:[#allocation2 + $0x8] sm:$0xff] }
 0x31e   :  { %v291_v19 = vadd.f32 %v289_v18, %v474_v1  ;;  %v299_v20 = vadd.f32 %v333_v16, %v290_v17 }
 0x320   :  { %v300_v21 = vadd.f32 %v333_v16, %v291_v19  ;;  %301 = vst.msk [vmem:[#allocation4] sm:$0xff] %vm34_vm0, %v299_v20 }
 0x322   :  { %302 = vst.msk [vmem:[#allocation4 + $0x8] sm:$0xff] %vm34_vm0, %v300_v21 }
 0x323   :  { %408 = shalt.err (!%p405_p4)
}
 0x324   :  { %s409_s30 = scalar_lea.hbm %s555_s7, 256 }
 0x325   :  { %p410_p5 = scmp.ne.s32.totalorder %s555_s7, %s409_s30  ;;  %p413_p6 = scmp.lt.u32.totalorder %s409_s30, %s555_s7 }
 0x327   :  { %p415_p7 = pnand %p413_p6, %p410_p5 }
 0x329   :  { %418 = shalt.err (!%p415_p7)
}
 0x32a   :  { %s424_s11 = smov 128   ;;  %s425_s12 = smov 8  }
 0x32b   :  { %314 = dma.vmem_to_hbm [thread:$0]  %s309_s0, 256, %s555_s7, [#allocation5], %s424_s11, %s424_s11, %s425_s12  }
 0x32c   :  { %419 = dma.done.wait [#allocation5], 256  }
 0x32d   :  { %420 = vsyncadd [#allocation5], 4294967040 }
 0x32e   :  { %318 = vsyncpa [#allocation5], 1 }

// kernel: transformer_encoder.4
= control target key start
LH: loop header
LB: loop body
LE: loop exit
PB: predicated region body
PF: predicated region fallthrough
CT: control target
= control target key end

     0   :  { %s1022_s15 = smov 0   ;;  %s1120_s0 = inlined_call_operand.vmem [shape: f32[2,8,32], index: 0, kind: input, shape index: {}]   ;;  %s1121_s1 = inlined_call_operand.vmem [shape: bf16[2,8,96], index: 1, kind: input, shape index: {}]   ;;  %s1122_s2 = inlined_call_operand.vmem [shape: bf16[32,32], index: 2, kind: input, shape index: {}]   ;;  %s1123_s3 = inlined_call_operand.vmem [shape: f32[1,32], index: 3, kind: input, shape index: {}]   ;;  %s1124_s4 = inlined_call_operand.vmem [shape: f32[2,8,32], index: 4, kind: output, shape index: {}]  }
   0x1 LB: > { %s826_s16 = sadd.s32 4294967295, %s979_s15   ;;  %p830_p0 = scmp.ge.s32.totalorder %s979_s15, 1  ;;  %s979_s15 = sphi %s1022_s15, %s14_s15  }
   0x2   : > { %p170_p1 = scmp.lt.s32.totalorder %s979_s15, 3 }
   0x4   : > { %p171_p2 = pnand %p830_p0, %p170_p1 }
   0x5   : > { %p198_p3 = scmp.lt.s32.totalorder (!%p171_p2), %s826_s16, 1  ;;  %v981_v0 = vmov (!%p171_p2), 0.0   ;;  %vm982_vm0 = vmmov (!%p171_p2), 0   ;;  %s983_s21 = smov (!%p171_p2), 96   ;;  %vm217_vm1 = vcmask (!%p171_p2), 64512   ;;  %vm282_vm2 = vcmask (!%p171_p2), 1043456  }
   0x6   : > { %174 = sbr.rel (%p171_p2) target bundleno = 1825 (0x721), region = 36  ;;  %874 = vmatprep.subr.bf16.mxu0 (!%p171_p2), %v981_v0  ;;  %876 = vmatprep.mubr.msk.bf16.mxu0 (!%p171_p2), %vm982_vm0, %v981_v0  ;;  %s984_s22 = smov (!%p171_p2), 64   ;;  %vm327_vm3 = vcmask (!%p171_p2), 60416   ;;  %vm447_vm4 = vcmask (!%p171_p2), 126016   ;;  %vm567_vm5 = vcmask (!%p171_p2), 191616   ;;  %vm687_vm6 = vcmask (!%p171_p2), 257216  }
   0x7   : > { %880 = vmatprep.subr.bf16.mxu1 (!%p171_p2), %v981_v0  ;;  %882 = vmatprep.mubr.msk.bf16.mxu1 (!%p171_p2), %vm982_vm0, %v981_v0  ;;  %s985_s23 = smov (!%p171_p2), 88   ;;  %s986_s24 = smov (!%p171_p2), 72   ;;  %vm706_vm7 = vcmask (!%p171_p2), 261120  }
   0x8   : > { %s987_s25 = smov (!%p171_p2), 120   ;;  %s988_s26 = smov (!%p171_p2), 80  }
   0x9   : > { %s989_s27 = smov (!%p171_p2), 112   ;;  %s990_s28 = smov (!%p171_p2), 104  }
   0xa   : > { %s991_s29 = smov (!%p171_p2), 56   ;;  %s992_s30 = smov (!%p171_p2), 48  }
   0xb   : > { %s993_s5 = smov (!%p171_p2), 40   ;;  %s994_s6 = smov (!%p171_p2), 8  }
   0xc   : > { %s995_s11 = smov (!%p171_p2), 16   ;;  %s996_s12 = smov (!%p171_p2), 24  }
   0xd   : > { %s1126_s16 = smov (!%p198_p3, %s826_s16), 1 }
   0xe   : > { %s832_s17 = sshll.u32 %s1126_s16, 2  ;;  %s831_s13 = sshll.u32 %s1126_s16, 3 }
   0xf   : > { %s205_s20 = scalar_lea.vmem %s1121_s1, %s832_s17  ;;  %s201_s18 = scalar_lea.vmem %s1120_s0, %s831_s13 }
  0x10   : > { %v211_v1 = vld [vmem:[%s205_s20] sm:$0xf] }
  0x11   : > { %v1042_v2 = vcombine.low %v211_v1, %v211_v1 }
  0x13   : > { %215 = vrot.lane.b32.xlu0 %v1042_v2, %s983_s21  ;;  %277 = vrot.lane.b32.xlu1 %v1042_v2, %s984_s22 }
  0x17   : > { %331 = vrot.lane.b32.xlu1 %v1042_v2, %s985_s23  ;;  %s209_s23 = scalar_lea.vmem %s1124_s4, %s831_s13 }
  0x85   : > { %v216_v3 = vpop.permute.xlu0 %215  ;;  %v278_v11 = vpop.permute.xlu1 %277 }
  0x86   : > { %v222_v4 = vsel %vm217_vm1, %v216_v3, 0  ;;  %v284_v12 = vsel %vm282_vm2, %v278_v11, 0 }
  0x87   : > { %875 = vmatpush3.bf16.xpose.msra.mxu0 %v222_v4  ;;  %881 = vmatpush3.bf16.msra.mxu1 %v284_v12 }
  0x88   : > { %892 = vmatprep.subr.bf16.mxu0 %v981_v0  ;;  %886 = vmatprep.subr.bf16.mxu1 %v981_v0 }
  0x89   : > { %v332_v18 = vpop.permute.xlu1 %331 }
  0x8a   : > { %v337_v24 = vsel %vm217_vm1, %v332_v18, 0 }
  0x8e   : > { %877 = vmatmul.mubr.msk.bf16.vlgmr.msra.gmra.mrb[0].mxu0 %vm217_vm1, %v211_v1 }
  0x8f   : > { %894 = vmatprep.mubr.msk.bf16.mxu0 %vm982_vm0, %v981_v0 }
 0x161   : > { %v258_v5 = vpop.f32.mrb[0].mxu0 }
 0x162   : > { %v264_v6 = vmul.f32 0.35355338, %v258_v5  ;;  %v878_v7 = vpop.f32.mrb[1].mxu0 }
 0x163   : > { %v261_v8 = vpop.f32.mrb[2].mxu0 }
 0x164   : > { %v879_v9 = vpop.f32.mrb[3].mxu0  ;;  %v265_v10 = vsel %vm217_vm1, %v264_v6, -inf }
 0x165   : > { %266 = vmax.xlane.f32.xlu0 %v265_v10 }
 0x17b   : > { %571 = vrot.lane.b32.xlu0 %v1042_v2, %s986_s24 }
 0x1f2   : > { %v267_v13 = vpop.xlane.xlu0 %266 }
 0x1f3   : > { %v268_v14 = vsub.f32 %v264_v6, %v267_v13 }
 0x1f5   : > { %v269_v15 = vmul.f32 1.442695, %v268_v14 }
 0x1f6   : > { %v572_v27 = vpop.permute.xlu0 %571 }
 0x1f7   : > { %957 = vpow2.f32 %v269_v15  ;;  %v577_v29 = vsel %vm217_vm1, %v572_v27, 0 }
 0x201   : > { %v958_v16 = vpop.eup %957 }
 0x202   : > { %v271_v17 = vsel %vm217_vm1, %v958_v16, 0.0 }
 0x203   : > { %272 = vadd.xlane.f32.xlu1 %v271_v17 }
 0x214   : > { %329 = vrot.lane.b32.xlu1 %v1042_v2, %s987_s25 }
 0x218   : > { %451 = vrot.lane.b32.xlu1 %v1042_v2, %s988_s26 }
 0x21c   : > { %449 = vrot.lane.b32.xlu1 %v1042_v2, %s989_s27 }
 0x220   : > { %569 = vrot.lane.b32.xlu1 %v1042_v2, %s990_s28 }
 0x290   : > { %v273_v19 = vpop.xlane.xlu1 %272 }
 0x291   : > { %959 = vrcp.f32 %v273_v19 }
 0x294   : > { %v330_v22 = vpop.permute.xlu1 %329 }
 0x298   : > { %v452_v25 = vpop.permute.xlu1 %451 }
 0x299   : > { %v457_v26 = vsel %vm217_vm1, %v452_v25, 0 }
 0x29b   : > { %v960_v20 = vpop.eup %959 }
 0x29c   : > { %v275_v21 = vmul.f32 %v960_v20, %v958_v16  ;;  %v450_v28 = vpop.permute.xlu1 %449 }
 0x29e   : > { %v276_v23 = vpack.c.bf16 %v275_v21, %v275_v21 }
 0x2a0   : > { %883 = vmatmul.mubr.msk.bf16.vlgmr.msra.gmra.mrb[0].mxu1 %vm217_vm1, %v276_v23  ;;  %v570_v30 = vpop.permute.xlu1 %569 }
 0x2a1   : > { %887 = vmatpush3.bf16.xpose.msra.mxu1 %v337_v24  ;;  %888 = vmatprep.mubr.msk.bf16.mxu1 %vm982_vm0, %v981_v0 }
 0x2a2   : > { %898 = vmatprep.subr.bf16.mxu1 %v981_v0 }
 0x2a8   : > { %889 = vmatmul.mubr.msk.bf16.vlgmr.msra.gmra.mrb[4].mxu1 %vm217_vm1, %v330_v22 }
 0x2a9   : > { %899 = vmatpush3.bf16.xpose.msra.mxu1 %v457_v26  ;;  %900 = vmatprep.mubr.msk.bf16.mxu1 %vm982_vm0, %v981_v0 }
 0x2aa   : > { %910 = vmatprep.subr.bf16.mxu1 %v981_v0 }
 0x2b0   : > { %901 = vmatmul.mubr.msk.bf16.vlgmr.msra.gmra.mrb[8].mxu1 %vm217_vm1, %v450_v28 }
 0x2b1   : > { %911 = vmatpush3.bf16.xpose.msra.mxu1 %v577_v29  ;;  %912 = vmatprep.mubr.msk.bf16.mxu1 %vm982_vm0, %v981_v0  ;;  %v955_v29 = vld [vmem:[%s1122_s2] sm:$0xff]  }
 0x2b2   : > { %922 = vmatprep.subr.bf16.mxu1 %v981_v0 }
 0x2b8   : > { %913 = vmatmul.mubr.msk.bf16.vlgmr.msra.gmra.mrb[12].mxu1 %vm217_vm1, %v570_v30 }
 0x2b9   : > { %926 = vmatprep.mubr.msk.bf16.mxu1 %vm982_vm0, %v981_v0  ;;  %923 = vmatpush3.bf16.msra.mxu1 %v955_v29 }
 0x2ba   : > { %924 = vmatprep.subr.bf16.mxu1 %v981_v0 }
 0x373   : > { %v320_v31 = vpop.f32.mrb[0].mxu1 }
 0x374   : > { %v326_v32 = vpack.c.bf16 %v320_v31, %v320_v31  ;;  %v884_v33 = vpop.f32.mrb[1].mxu1  ;;  %v956_v31 = vld [vmem:[%s1122_s2 + $0x8] sm:$0xff]  }
 0x375   : > { %v323_v34 = vpop.f32.mrb[2].mxu1  ;;  %925 = vmatpush3.bf16.msra.mxu1 %v956_v31 }
 0x376   : > { %328 = vst.msk [vmem:[#allocation2] sm:$0xf] %vm327_vm3, %v326_v32  ;;  %v885_v35 = vpop.f32.mrb[3].mxu1 }
 0x37b   : > { %v373_v36 = vpop.f32.mrb[4].mxu1 }
 0x37c   : > { %v379_v37 = vmul.f32 0.35355338, %v373_v36  ;;  %v890_v38 = vpop.f32.mrb[5].mxu1 }
 0x37d   : > { %v376_v39 = vpop.f32.mrb[6].mxu1 }
 0x37e   : > { %v891_v40 = vpop.f32.mrb[7].mxu1  ;;  %v380_v41 = vsel %vm217_vm1, %v379_v37, -inf }
 0x37f   : > { %381 = vmax.xlane.f32.xlu1 %v380_v41 }
 0x383   : > { %v493_v42 = vpop.f32.mrb[8].mxu1 }
 0x384   : > { %v499_v43 = vmul.f32 0.35355338, %v493_v42  ;;  %v902_v44 = vpop.f32.mrb[9].mxu1 }
 0x385   : > { %v496_v45 = vpop.f32.mrb[10].mxu1  ;;  %v750_v44 = vld [vmem:[%s201_s18] sm:$0xff] }
 0x386   : > { %v500_v46 = vsel %vm217_vm1, %v499_v43, -inf  ;;  %v903_v47 = vpop.f32.mrb[11].mxu1 }
 0x387   : > { %501 = vmax.xlane.f32.xlu0 %v500_v46  ;;  %v849_v46 = vld [vmem:[%s1123_s3] ss:$0 sm:$0xff] }
 0x38b   : > { %v613_v48 = vpop.f32.mrb[12].mxu1 }
 0x38c   : > { %v619_v49 = vmul.f32 0.35355338, %v613_v48  ;;  %v914_v50 = vpop.f32.mrb[13].mxu1 }
 0x38d   : > { %v616_v51 = vpop.f32.mrb[14].mxu1 }
 0x38e   : > { %v620_v52 = vsel %vm217_vm1, %v619_v49, -inf  ;;  %v915_v53 = vpop.f32.mrb[15].mxu1 }
 0x38f   : > { %621 = vmax.xlane.f32.xlu1 %v620_v52 }
 0x40c   : > { %v382_v54 = vpop.xlane.xlu1 %381 }
 0x40d   : > { %v383_v55 = vsub.f32 %v379_v37, %v382_v54 }
 0x40f   : > { %v384_v56 = vmul.f32 1.442695, %v383_v55 }
 0x411   : > { %961 = vpow2.f32 %v384_v56 }
 0x414   : > { %v502_v1 = vpop.xlane.xlu0 %501 }
 0x415   : > { %v503_v3 = vsub.f32 %v499_v43, %v502_v1 }
 0x417   : > { %v504_v4 = vmul.f32 1.442695, %v503_v3 }
 0x41b   : > { %v962_v57 = vpop.eup %961 }
 0x41c   : > { %v622_v58 = vpop.xlane.xlu1 %621  ;;  %v386_v59 = vsel %vm217_vm1, %v962_v57, 0.0 }
 0x41d   : > { %v623_v60 = vsub.f32 %v619_v49, %v622_v58  ;;  %387 = vadd.xlane.f32.xlu1 %v386_v59 }
 0x41f   : > { %v624_v61 = vmul.f32 1.442695, %v623_v60 }
 0x421   : > { %963 = vpow2.f32 %v624_v61 }
 0x422   : > { %965 = vpow2.f32 %v504_v4 }
 0x42b   : > { %v964_v62 = vpop.eup %963 }
 0x42c   : > { %v626_v63 = vsel %vm217_vm1, %v964_v62, 0.0  ;;  %v966_v5 = vpop.eup %965 }
 0x42d   : > { %627 = vadd.xlane.f32.xlu0 %v626_v63  ;;  %v506_v6 = vsel %vm217_vm1, %v966_v5, 0.0 }
 0x42e   : > { %392 = vrot.lane.b32.xlu1 %v1042_v2, %s991_s29 }
 0x443   : > { %512 = vrot.lane.b32.xlu0 %v1042_v2, %s992_s30 }
 0x452   : > { %507 = vadd.xlane.f32.xlu1 %v506_v6 }
 0x463   : > { %632 = vrot.lane.b32.xlu1 %v1042_v2, %s993_s5 }
 0x4aa   : > { %v388_v7 = vpop.xlane.xlu1 %387 }
 0x4ab   : > { %967 = vrcp.f32 %v388_v7 }
 0x4ae   : > { %v393_v8 = vpop.permute.xlu1 %392 }
 0x4af   : > { %v398_v9 = vsel %vm282_vm2, %v393_v8, 0 }
 0x4b0   : > { %893 = vmatpush3.bf16.msra.mxu0 %v398_v9 }
 0x4b1   : > { %904 = vmatprep.subr.bf16.mxu0 %v981_v0 }
 0x4b5   : > { %v968_v10 = vpop.eup %967 }
 0x4b6   : > { %v390_v11 = vmul.f32 %v968_v10, %v962_v57 }
 0x4b8   : > { %v391_v12 = vpack.c.bf16 %v390_v11, %v390_v11 }
 0x4ba   : > { %895 = vmatmul.mubr.msk.bf16.vlgmr.msra.gmra.mrb[4].mxu0 %vm217_vm1, %v391_v12  ;;  %v628_v13 = vpop.xlane.xlu0 %627 }
 0x4bb   : > { %906 = vmatprep.mubr.msk.bf16.mxu0 %vm982_vm0, %v981_v0 }
 0x4be   : > { %v513_v14 = vpop.permute.xlu0 %512 }
 0x4bf   : > { %v518_v2 = vsel %vm282_vm2, %v513_v14, 0 }
 0x4c0   : > { %905 = vmatpush3.bf16.msra.mxu0 %v518_v2 }
 0x4c1   : > { %916 = vmatprep.subr.bf16.mxu0 %v981_v0 }
 0x4df   : > { %v508_v15 = vpop.xlane.xlu1 %507 }
 0x4e0   : > { %969 = vrcp.f32 %v508_v15 }
 0x4e1   : > { %971 = vrcp.f32 %v628_v13 }
 0x4e3   : > { %v633_v17 = vpop.permute.xlu1 %632 }
 0x4e4   : > { %v638_v19 = vsel %vm282_vm2, %v633_v17, 0 }
 0x4ea   : > { %v970_v16 = vpop.eup %969 }
 0x4eb   : > { %v510_v18 = vmul.f32 %v970_v16, %v966_v5  ;;  %v972_v21 = vpop.eup %971 }
 0x4ec   : > { %v630_v22 = vmul.f32 %v972_v21, %v964_v62 }
 0x4ed   : > { %v511_v20 = vpack.c.bf16 %v510_v18, %v510_v18 }
 0x4ee   : > { %v631_v23 = vpack.c.bf16 %v630_v22, %v630_v22 }
 0x4ef   : > { %907 = vmatmul.mubr.msk.bf16.vlgmr.msra.gmra.mrb[8].mxu0 %vm217_vm1, %v511_v20 }
 0x4f0   : > { %917 = vmatpush3.bf16.msra.mxu0 %v638_v19  ;;  %918 = vmatprep.mubr.msk.bf16.mxu0 %vm982_vm0, %v981_v0 }
 0x4f7   : > { %919 = vmatmul.mubr.msk.bf16.vlgmr.msra.gmra.mrb[12].mxu0 %vm217_vm1, %v631_v23 }
 0x58d   : > { %v434_v24 = vpop.f32.mrb[4].mxu0 }
 0x58e   : > { %v852_v25 = vpack.c.bf16 %v434_v24, %v434_v24  ;;  %v896_v26 = vpop.f32.mrb[5].mxu0 }
 0x58f   : > { %v437_v27 = vpop.f32.mrb[6].mxu0 }
 0x590   : > { %444 = vrot.lane.b32.xlu1 %v852_v25, %s994_s6  ;;  %v897_v28 = vpop.f32.mrb[7].mxu0 }
 0x5c2   : > { %v554_v30 = vpop.f32.mrb[8].mxu0 }
 0x5c3   : > { %v853_v32 = vpack.c.bf16 %v554_v30, %v554_v30  ;;  %v908_v33 = vpop.f32.mrb[9].mxu0 }
 0x5c4   : > { %v557_v34 = vpop.f32.mrb[10].mxu0 }
 0x5c5   : > { %564 = vrot.lane.b32.xlu0 %v853_v32, %s995_s11  ;;  %v909_v35 = vpop.f32.mrb[11].mxu0 }
 0x5ca   : > { %v674_v36 = vpop.f32.mrb[12].mxu0 }
 0x5cb   : > { %v854_v37 = vpack.c.bf16 %v674_v36, %v674_v36  ;;  %v920_v38 = vpop.f32.mrb[13].mxu0 }
 0x5cc   : > { %v677_v39 = vpop.f32.mrb[14].mxu0 }
 0x5cd   : > { %684 = vrot.lane.b32.xlu1 %v854_v37, %s996_s12  ;;  %v921_v40 = vpop.f32.mrb[15].mxu0 }
 0x602   : > { %v445_v41 = vpop.permute.xlu1 %444 }
 0x603   : > { %448 = vst.msk [vmem:[#allocation2] sm:$0xf] %vm447_vm4, %v445_v41 }
 0x637   : > { %v565_v42 = vpop.permute.xlu0 %564 }
 0x638   : > { %568 = vst.msk [vmem:[#allocation2] sm:$0xf] %vm567_vm5, %v565_v42 }
 0x63f   : > { %v685_v0 = vpop.permute.xlu1 %684 }
 0x640   : > { %688 = vst.msk [vmem:[#allocation2] sm:$0xf] %vm687_vm6, %v685_v0 }
 0x647   : > { %v689_v43 = vld [vmem:[#allocation2] sm:$0xf] }
 0x648   : > { %927 = vmatmul.mubr.msk.bf16.vlgmr.msra.gmra.mrb[16].mxu1 %vm706_vm7, %v689_v43 }
 0x71b   : > { %v744_v45 = vpop.f32.mrb[16].mxu1 }
 0x71c   : > { %v751_v47 = vadd.f32 %v750_v44, %v744_v45  ;;  %v928_v48 = vpop.f32.mrb[17].mxu1 }
 0x71d   : > { %v747_v49 = vpop.f32.mrb[18].mxu1 }
 0x71e   : > { %v759_v50 = vadd.f32 %v849_v46, %v751_v47  ;;  %v929_v51 = vpop.f32.mrb[19].mxu1 }
 0x720   : > { %760 = vst.msk [vmem:[%s209_s23] sm:$0xff] %vm706_vm7, %v759_v50 }
 0x721 PF: > { %s14_s15 = sadd.s32 1, %s979_s15  }
 0x722   : > { %p11_p4 = scmp.ge.s32.totalorder %s14_s15, 4  }
 0x724   :  { %13 = sbr.rel (!%p11_p4) target bundleno = 1 (0x1), region = 69 }

</bundles_post_ra>
